<compile_context>
chip_gen: v6e
topology: v6e:2x2x1
jax: 0.10.0
libtpu: 0.0.40
codegen_flags: <defaults>
</compile_context>

<pallas_src>
import functools

import jax
import jax.numpy as jnp
from jax.experimental import pallas as pl
from jax.experimental.pallas import tpu as pltpu


_LEAKY_SLOPE = 0.01


def _round_up(v, m):
    return (v + m - 1) // m * m


@functools.lru_cache(maxsize=None)
def _roll_is_like_jnp_roll() -> bool:
    """One-time cached probe of pltpu.roll's rotation direction.

    Guards the im2col shift math against roll-direction semantics differences
    across JAX versions; costs a single tiny kernel launch on first use.
    """
    def probe(x_ref, o_ref):
        o_ref[...] = pltpu.roll(x_ref[...], 1, 1)

    x = jnp.tile(jnp.arange(128, dtype=jnp.float32)[None, :], (8, 1))
    out = pl.pallas_call(
        probe, out_shape=jax.ShapeDtypeStruct((8, 128), jnp.float32))(x)
    # jnp.roll semantics (shift towards higher indices): out[:, 1] == x[:, 0] == 0
    return bool(out[0, 1] == 0.0)


def _unet_conv_block_kernel(x_ref, w1_ref, b1_ref, w2_ref, b2_ref, o_ref, *,
                            height, width, roll_fwd):
    n = x_ref.shape[-1]          # padded B*H*W (lane axis)
    hw = height * width

    # ---- hoisted per-position indices + 3x3 boundary masks (shared by both
    # conv layers).  The roll wrap-band (and cross-image bleed from folding
    # the batch into lanes) lands exactly on positions these masks zero. -----
    pos = jax.lax.broadcasted_iota(jnp.int32, (1, n), 1)
    sp = pos % hw                      # position inside one image
    h_idx = sp // width
    w_idx = sp - h_idx * width
    row_ok = {-1: h_idx >= 1, 0: None, 1: h_idx <= height - 2}
    col_ok = {-1: w_idx >= 1, 0: None, 1: w_idx <= width - 2}

    shifts, masks = [], []
    for dy in (-1, 0, 1):
        for dx in (-1, 0, 1):
            shifts.append(dy * width + dx)
            r, c = row_ok[dy], col_ok[dx]
            if r is None:
                masks.append(c)
            elif c is None:
                masks.append(r)
            else:
                masks.append(r & c)

    def conv3x3_leaky(inp, w_ref, b_ref):
        # im2col: 9 masked/rolled taps stacked along the contraction axis,
        # consumed by a single MXU matmul.
        taps = []
        for s, m in zip(shifts, masks):
            if s == 0:
                tap = inp
            else:
                amt = (-s) % n if roll_fwd else s % n
                tap = pltpu.roll(inp, amt, 1)          # XLU lane rotation
            if m is not None:
                tap = jnp.where(m, tap, 0.0)
            taps.append(tap)
        im = jnp.concatenate(taps, axis=0)             # (9*Cin_p, n)
        acc = jnp.dot(w_ref[...], im, preferred_element_type=jnp.float32)
        acc = acc + b_ref[...]
        return jnp.maximum(acc, _LEAKY_SLOPE * acc)    # LeakyReLU(0.01)

    x = x_ref[...].astype(jnp.float32)                 # (Cin_p, n)
    mid = conv3x3_leaky(x, w1_ref, b1_ref)             # (Cmid_p, n)
    out = conv3x3_leaky(mid, w2_ref, b2_ref)           # (Cout_p, n)
    o_ref[...] = out.astype(o_ref.dtype)


def _pack_conv_weight(w, cout_pad, cin_pad):
    """(Cout, Cin, 3, 3) -> (Cout_pad, 9*Cin_pad), columns ordered
    (ky, kx, cin) to match the in-kernel tap stacking order."""
    cout, cin = w.shape[0], w.shape[1]
    w = jnp.pad(w, ((0, cout_pad - cout), (0, cin_pad - cin), (0, 0), (0, 0)))
    w = jnp.transpose(w, (0, 2, 3, 1))                 # (Cout_p, 3, 3, Cin_p)
    return w.reshape(cout_pad, 9 * cin_pad).astype(jnp.float32)


def unet_conv_block(x, w1, b1, w2, b2):
    """x: (B, Cin, H, W); w1: (Cmid, Cin, 3, 3); b1: (Cmid,);
    w2: (Cout, Cmid, 3, 3); b2: (Cout,).  Returns (B, Cout, H, W)."""
    B, Cin, H, W = x.shape
    Cmid, Cout = w1.shape[0], w2.shape[0]
    HW = H * W
    N = B * HW

    # Channel padding to sublane multiples (8); lane padding to 128 multiples.
    Cin_p, Cmid_p, Cout_p = (_round_up(c, 8) for c in (Cin, Cmid, Cout))
    N_p = _round_up(N, 128)

    # Lane-dense, batch-folded layout: (B, Cin, H, W) -> (Cin_p, B*H*W).
    x2 = jnp.transpose(x, (1, 0, 2, 3)).reshape(Cin, N)
    x2 = jnp.pad(x2, ((0, Cin_p - Cin), (0, N_p - N))).astype(jnp.float32)

    w1_2d = _pack_conv_weight(w1, Cmid_p, Cin_p)       # (Cmid_p, 9*Cin_p)
    w2_2d = _pack_conv_weight(w2, Cout_p, Cmid_p)      # (Cout_p, 9*Cmid_p)
    b1_col = jnp.pad(b1, (0, Cmid_p - Cmid)).reshape(Cmid_p, 1).astype(jnp.float32)
    b2_col = jnp.pad(b2, (0, Cout_p - Cout)).reshape(Cout_p, 1).astype(jnp.float32)

    flops = 2 * N * 9 * (Cin * Cmid + Cmid * Cout)
    bytes_accessed = (x.size + B * Cout * HW) * x.dtype.itemsize + (
        w1_2d.size + w2_2d.size + b1_col.size + b2_col.size) * 4

    kernel = functools.partial(
        _unet_conv_block_kernel,
        height=H, width=W, roll_fwd=_roll_is_like_jnp_roll())

    out_flat = pl.pallas_call(
        kernel,
        out_shape=jax.ShapeDtypeStruct((Cout_p, N_p), x.dtype),
        grid=(1,),
        in_specs=[
            pl.BlockSpec((Cin_p, N_p), lambda i: (0, 0)),
            pl.BlockSpec((Cmid_p, 9 * Cin_p), lambda i: (0, 0)),
            pl.BlockSpec((Cmid_p, 1), lambda i: (0, 0)),
            pl.BlockSpec((Cout_p, 9 * Cmid_p), lambda i: (0, 0)),
            pl.BlockSpec((Cout_p, 1), lambda i: (0, 0)),
        ],
        out_specs=pl.BlockSpec((Cout_p, N_p), lambda i: (0, 0)),
        compiler_params=pltpu.CompilerParams(
            dimension_semantics=("arbitrary",),
        ),
        cost_estimate=pl.CostEstimate(
            flops=flops, transcendentals=0, bytes_accessed=bytes_accessed),
    )(x2, w1_2d, b1_col, w2_2d, b2_col)

    out = out_flat[:Cout, :N].reshape(Cout, B, H, W)
    return jnp.transpose(out, (1, 0, 2, 3)).astype(x.dtype)


def unet_conv_block_ref(x, w1, b1, w2, b2):
    """Pure-JAX reference mirroring the PyTorch forward."""
    dn = jax.lax.conv_dimension_numbers(x.shape, w1.shape, ("NCHW", "OIHW", "NCHW"))
    y = jax.lax.conv_general_dilated(
        x, w1, (1, 1), "SAME", dimension_numbers=dn,
        precision=jax.lax.Precision.HIGHEST)
    y = y + b1[None, :, None, None]
    y = jnp.where(y >= 0, y, 0.01 * y)
    dn2 = jax.lax.conv_dimension_numbers(y.shape, w2.shape, ("NCHW", "OIHW", "NCHW"))
    y = jax.lax.conv_general_dilated(
        y, w2, (1, 1), "SAME", dimension_numbers=dn2,
        precision=jax.lax.Precision.HIGHEST)
    y = y + b2[None, :, None, None]
    return jnp.where(y >= 0, y, 0.01 * y)


if __name__ == "__main__":
    B, Cin, Cout, H, W = 2, 4, 8, 16, 16
    Cmid = Cout // 2

    key = jax.random.PRNGKey(0)
    kx, k1, kb1, k2, kb2 = jax.random.split(key, 5)

    x = jax.random.normal(kx, (B, Cin, H, W), dtype=jnp.float32)
    w1 = jax.random.normal(k1, (Cmid, Cin, 3, 3), dtype=jnp.float32) * 0.3
    b1 = jax.random.normal(kb1, (Cmid,), dtype=jnp.float32) * 0.1
    w2 = jax.random.normal(k2, (Cout, Cmid, 3, 3), dtype=jnp.float32) * 0.3
    b2 = jax.random.normal(kb2, (Cout,), dtype=jnp.float32) * 0.1

    out = jax.block_until_ready(unet_conv_block(x, w1, b1, w2, b2))
    ref = unet_conv_block_ref(x, w1, b1, w2, b2)

    assert out.shape == (B, Cout, H, W)
    err = float(jnp.max(jnp.abs(out - ref)))
    assert jnp.allclose(out, ref, atol=2e-4, rtol=2e-4), err

    print("KERNEL_OK")
</pallas_src>

<mosaic_0001>
module attributes {stable_mosaic.version = 11 : i64} {
  func.func @probe(%arg0: memref<8x128xf32, #tpu.memory_space<vmem>>, %arg1: memref<8x128xf32, #tpu.memory_space<vmem>>) attributes {dimension_semantics = [], scalar_prefetch = 0 : i64, scratch_operands = 0 : i64, tpu.core_type = #tpu.core_type<tc>} {
    %c0 = arith.constant 0 : index
    %c0_0 = arith.constant 0 : index
    %0 = vector.load %arg0[%c0, %c0_0] : memref<8x128xf32, #tpu.memory_space<vmem>>, vector<8x128xf32>
    %c1_i32 = arith.constant 1 : i32
    %1 = tpu.dynamic_rotate %0 by %c1_i32 dim 1 : vector<8x128xf32>, i32 -> vector<8x128xf32>
    %c0_1 = arith.constant 0 : index
    %c0_2 = arith.constant 0 : index
    %2 = vector.load %arg1[%c0_1, %c0_2] : memref<8x128xf32, #tpu.memory_space<vmem>>, vector<8x128xf32>
    tpu.vector_store %arg1[%c0_1, %c0_2], %1 {strides = array<i32>} : memref<8x128xf32, #tpu.memory_space<vmem>>, vector<8x128xf32>,
    return
  }
}

</mosaic_0001>

<bundles_post_ra>
// kernel: tpu_custom_call.1
= control target key start
LH: loop header
LB: loop body
LE: loop exit
PB: predicated region body
PF: predicated region fallthrough
CT: control target
= control target key end

     0   :  { %6 = vsyncpa [#allocation3], 0  ;;  %s106_s0 = inlined_call_operand.hbm [shape: f32[8,128], index: 0, kind: input, shape index: {}]   ;;  %s107_s1 = inlined_call_operand.hbm [shape: f32[8,128], index: 1, kind: output, shape index: {}]  }
   0x1   :  { %7 = vsyncpa [#allocation4], 0  ;;  %s87_s6 = smov [#allocation2]  }
   0x2   :  { %s14_s7 = sshll.u32 %s87_s6, 4  ;;  %s15_s7 = int_to_ptr.vmem [resolvable:$true] %s14_s7 }
   0x3   :  { %s51_s8 = scalar_lea.vmem %s15_s7, 128  ;;  %p56_p1 = scmp.lt.s32.totalorder %s15_s7, %s15_s7 }
   0x4   :  { %p52_p0 = scmp.ne.s32.totalorder %s15_s7, %s51_s8  ;;  %p57_p2 = scmp.lt.s32.totalorder %s51_s8, %s51_s8 }
   0x6   :  { %p58_p3 = por %p57_p2, %p56_p1 }
   0x8   :  { %p59_p4 = pnand %p58_p3, %p52_p0 }
   0xa   :  { %62 = shalt.err (!%p59_p4)
}
   0xb   :  { %17 = dma.hbm_to_vmem [thread:$0]  %s106_s0, 128, %s15_s7, [#allocation3]  }
   0xc   :  { %83 = dma.done.wait [#allocation3], 128  }
   0xd   :  { %84 = vsyncadd [#allocation3], 4294967168  ;;  %v21_v0 = vld [vmem:[#allocation2] sm:$0xff]  ;;  %s88_s11 = smov 1   ;;  %s89_s12 = smov [#allocation5]  }
   0xe   :  { %22 = vrot.lane.b32.xlu0 %v21_v0, %s88_s11  ;;  %s31_s13 = sshll.u32 %s89_s12, 4  ;;  %s32_s13 = int_to_ptr.vmem [resolvable:$true] %s31_s13 }
   0xf   :  { %s63_s14 = scalar_lea.vmem %s32_s13, 128  ;;  %p68_p6 = scmp.lt.s32.totalorder %s32_s13, %s32_s13 }
  0x10   :  { %p64_p5 = scmp.ne.s32.totalorder %s32_s13, %s63_s14  ;;  %p69_p7 = scmp.lt.s32.totalorder %s63_s14, %s63_s14 }
  0x12   :  { %p70_p8 = por %p69_p7, %p68_p6 }
  0x14   :  { %p71_p9 = pnand %p70_p8, %p64_p5 }
  0x80   :  { %v23_v1 = vpop.permute.xlu0 %22 }
  0x81   :  { %24 = vst [vmem:[#allocation5] sm:$0xff] %v23_v1 }
  0x82   :  { %74 = shalt.err (!%p71_p9)
}
  0x83   :  { %34 = dma.vmem_to_hbm [thread:$0]  %s32_s13, 128, %s107_s1, [#allocation4]  }
  0x84   :  { %85 = dma.done.wait [#allocation4], 128  }
  0x85   :  { %86 = vsyncadd [#allocation4], 4294967168 }
  0x86   :  { %38 = vsyncpa [#allocation3], 1 }
  0x87   :  { %39 = vsyncpa [#allocation4], 1 }

</bundles_post_ra>
